<compile_context>
chip_gen: v7x
topology: tpu7x:2x2x1
jax: 0.10.0
libtpu: 0.0.40
codegen_flags: <defaults>
</compile_context>

<pallas_src>
import functools

import jax
import jax.numpy as jnp
from jax.experimental import pallas as pl
from jax.experimental.pallas import tpu as pltpu

IN_DIM = 4
KPAD = 128             # fc1 contraction dim padded to a full lane width (MXU)
H1, H2, H3 = 512, 256, 256
N_ACTIONS = 2
OUT_PAD = 128          # lane-dense output width (first N_ACTIONS columns real)


def _round_up(x, m):
    return ((x + m - 1) // m) * m


def _choose_tb(batch):
    """Batch tile: >=2 grid tiles when possible (v7x megacore), multiple of 16
    (bf16 min sublane tile), capped at 1024 to bound VMEM temporaries."""
    tb = _round_up(pl.cdiv(batch, 2), 16)
    return int(max(16, min(1024, tb)))


def _qnet_kernel(x_ref, w1_ref, b1_ref, w2_ref, b2_ref, w3_ref, b3_ref,
                 wq_ref, bq_ref, q_ref, xpad_ref):
    # ---- fc1 on the MXU: lane-dense zero-padded lhs --------------------------
    # Re-zero + fill every grid step (cheap: ~TB/8 vst) so the scratch is valid
    # on every core when the "parallel" batch axis is split across TensorCores.
    xpad_ref[...] = jnp.zeros_like(xpad_ref)
    xpad_ref[:, 0:IN_DIM] = x_ref[...].astype(jnp.bfloat16)

    h = jnp.dot(xpad_ref[...], w1_ref[...],
                preferred_element_type=jnp.float32) + b1_ref[...]
    h = jnp.maximum(h.astype(jnp.bfloat16), 0.0)          # packed-bf16 ReLU

    # ---- fc2 / fc3 / fc_q: bf16 MXU matmuls, f32 accumulation ----------------
    h = jnp.dot(h, w2_ref[...], preferred_element_type=jnp.float32) + b2_ref[...]
    h = jnp.maximum(h.astype(jnp.bfloat16), 0.0)

    h = jnp.dot(h, w3_ref[...], preferred_element_type=jnp.float32) + b3_ref[...]
    h = jnp.maximum(h.astype(jnp.bfloat16), 0.0)

    q = jnp.dot(h, wq_ref[...], preferred_element_type=jnp.float32) + bq_ref[...]
    q_ref[...] = q.astype(q_ref.dtype)                     # bf16 lane-dense store


@functools.partial(jax.jit, static_argnames=("tb",))
def qnetwork_forward(state, params, *, tb=None):
    """state: (B, 4) float32. Returns (B, 2) float32 Q-values."""
    w1, b1 = params["w1"], params["b1"]
    w2, b2 = params["w2"], params["b2"]
    w3, b3 = params["w3"], params["b3"]
    wq, bq = params["wq"], params["bq"]             # already padded to OUT_PAD

    state = state.astype(jnp.float32)
    B = state.shape[0]
    TB = _round_up(int(tb), 16) if tb is not None else _choose_tb(B)
    B_pad = _round_up(B, TB)
    x = state if B_pad == B else jnp.pad(state, ((0, B_pad - B), (0, 0)))
    num_tiles = B_pad // TB

    # Weight/bias blocks are the full arrays and always map to block 0, so they
    # are DMA'd once and stay VMEM-resident across all grid steps.
    res = lambda shape: pl.BlockSpec(shape, lambda i: tuple(0 for _ in shape))

    weight_bytes = sum(int(a.size) * a.dtype.itemsize
                       for a in (w1, b1, w2, b2, w3, b3, wq, bq))
    cost = pl.CostEstimate(
        flops=2 * B_pad * (KPAD * H1 + H1 * H2 + H2 * H3 + H3 * OUT_PAD),
        transcendentals=0,
        bytes_accessed=weight_bytes + int(x.size) * 4 + B_pad * OUT_PAD * 2,
    )

    out = pl.pallas_call(
        _qnet_kernel,
        out_shape=jax.ShapeDtypeStruct((B_pad, OUT_PAD), jnp.bfloat16),
        grid=(num_tiles,),
        in_specs=[
            pl.BlockSpec((TB, IN_DIM), lambda i: (i, 0)),   # x tile streams
            res(w1.shape), res(b1.shape),
            res(w2.shape), res(b2.shape),
            res(w3.shape), res(b3.shape),
            res(wq.shape), res(bq.shape),
        ],
        out_specs=pl.BlockSpec((TB, OUT_PAD), lambda i: (i, 0)),
        scratch_shapes=[pltpu.VMEM((TB, KPAD), jnp.bfloat16)],  # padded fc1 lhs
        compiler_params=pltpu.CompilerParams(
            dimension_semantics=("parallel",),              # v7x: 2 TCs split batch
            vmem_limit_bytes=32 * 1024 * 1024),
        cost_estimate=cost,
    )(x, w1, b1, w2, b2, w3, b3, wq, bq)

    return out[:B, :N_ACTIONS].astype(jnp.float32)


def init_params(key):
    """nn.Linear-style U(-1/sqrt(fan_in), 1/sqrt(fan_in)) init.

    Weights stored in bf16 (halves the dominant weight DMA); biases in f32.
    w1 is zero-padded along the input dim to KPAD (MXU fc1); fc_q is
    zero-padded from 2 to OUT_PAD output columns for lane-dense stores.
    Note: bf16 weights/activations make results differ from an f32 PyTorch
    QNetwork by up to ~4e-3 relative — acceptable for RL Q-values.
    """
    dims = [(IN_DIM, H1), (H1, H2), (H2, H3), (H3, N_ACTIONS)]
    names = ["1", "2", "3", "q"]
    params = {}
    for (fan_in, fan_out), name in zip(dims, names):
        key, kw, kb = jax.random.split(key, 3)
        bound = 1.0 / jnp.sqrt(jnp.float32(fan_in))
        w = jax.random.uniform(kw, (fan_in, fan_out), jnp.float32,
                               minval=-bound, maxval=bound)
        b = jax.random.uniform(kb, (1, fan_out), jnp.float32,
                               minval=-bound, maxval=bound)
        if name == "1":   # pad the contraction dim for the MXU fc1 pass
            w = jnp.pad(w, ((0, KPAD - fan_in), (0, 0)))
        if name == "q":   # pad the action dim to a full lane width
            w = jnp.pad(w, ((0, 0), (0, OUT_PAD - fan_out)))
            b = jnp.pad(b, ((0, 0), (0, OUT_PAD - fan_out)))
        params[f"w{name}"] = w.astype(jnp.bfloat16)
        params[f"b{name}"] = b
    return params


def qnetwork_reference(state, params):
    """Plain-JAX reference matching the kernel's numerics (bf16 weights and
    activations, f32 accumulation, bf16 output)."""
    x = state.astype(jnp.bfloat16)
    h = jnp.dot(x, params["w1"][:IN_DIM],
                preferred_element_type=jnp.float32) + params["b1"]
    h = jnp.maximum(h.astype(jnp.bfloat16), 0.0)
    h = jnp.dot(h, params["w2"],
                preferred_element_type=jnp.float32) + params["b2"]
    h = jnp.maximum(h.astype(jnp.bfloat16), 0.0)
    h = jnp.dot(h, params["w3"],
                preferred_element_type=jnp.float32) + params["b3"]
    h = jnp.maximum(h.astype(jnp.bfloat16), 0.0)
    q = jnp.dot(h, params["wq"],
                preferred_element_type=jnp.float32) + params["bq"]
    q = q.astype(jnp.bfloat16)
    return q[:, :N_ACTIONS].astype(jnp.float32)


if __name__ == "__main__":
    key = jax.random.PRNGKey(0)
    pkey, xkey = jax.random.split(key)
    params = init_params(pkey)

    # CartPole-like batch of 8 observations of dim 4 (tiny acting path).
    state = jax.random.normal(xkey, (8, IN_DIM), jnp.float32)
    q = jax.block_until_ready(qnetwork_forward(state, params))
    q_ref = qnetwork_reference(state, params)
    assert q.shape == (8, N_ACTIONS)
    assert jnp.allclose(q, q_ref, atol=1e-2, rtol=1e-2), "mismatch vs reference"

    # Larger, non-tile-multiple batch exercises the 2-tile "parallel" grid.
    big_state = jax.random.normal(jax.random.PRNGKey(1), (1000, IN_DIM),
                                  jnp.float32)
    q_big = jax.block_until_ready(qnetwork_forward(big_state, params))
    q_big_ref = qnetwork_reference(big_state, params)
    assert q_big.shape == (1000, N_ACTIONS)
    assert jnp.allclose(q_big, q_big_ref, atol=1e-2, rtol=1e-2), "mismatch (tiled)"

    print("KERNEL_OK")
</pallas_src>

<mosaic_0001>
module attributes {stable_mosaic.version = 11 : i64} {
  func.func @_qnet_kernel(%arg0: i32, %arg1: memref<16x4xf32, #tpu.memory_space<vmem>>, %arg2: memref<128x512xbf16, #tpu.memory_space<vmem>>, %arg3: memref<1x512xf32, #tpu.memory_space<vmem>>, %arg4: memref<512x256xbf16, #tpu.memory_space<vmem>>, %arg5: memref<1x256xf32, #tpu.memory_space<vmem>>, %arg6: memref<256x256xbf16, #tpu.memory_space<vmem>>, %arg7: memref<1x256xf32, #tpu.memory_space<vmem>>, %arg8: memref<256x128xbf16, #tpu.memory_space<vmem>>, %arg9: memref<1x128xf32, #tpu.memory_space<vmem>>, %arg10: memref<16x128xbf16, #tpu.memory_space<vmem>>, %arg11: memref<16x128xbf16, #tpu.memory_space<vmem>>) attributes {dimension_semantics = [#tpu.dimension_semantics<parallel>], iteration_bounds = array<i64: 1>, scalar_prefetch = 0 : i64, scratch_operands = 1 : i64, tpu.core_type = #tpu.core_type<tc>, window_params = [{transform_indices = @transform_0, window_bounds = array<i64: 16, 4>}, {pipeline_mode = #tpu.pipeline_mode<synchronous>, transform_indices = @transform_1, window_bounds = array<i64: 128, 512>}, {pipeline_mode = #tpu.pipeline_mode<synchronous>, transform_indices = @transform_2, window_bounds = array<i64: 1, 512>}, {pipeline_mode = #tpu.pipeline_mode<synchronous>, transform_indices = @transform_3, window_bounds = array<i64: 512, 256>}, {pipeline_mode = #tpu.pipeline_mode<synchronous>, transform_indices = @transform_4, window_bounds = array<i64: 1, 256>}, {pipeline_mode = #tpu.pipeline_mode<synchronous>, transform_indices = @transform_5, window_bounds = array<i64: 256, 256>}, {pipeline_mode = #tpu.pipeline_mode<synchronous>, transform_indices = @transform_6, window_bounds = array<i64: 1, 256>}, {pipeline_mode = #tpu.pipeline_mode<synchronous>, transform_indices = @transform_7, window_bounds = array<i64: 256, 128>}, {pipeline_mode = #tpu.pipeline_mode<synchronous>, transform_indices = @transform_8, window_bounds = array<i64: 1, 128>}, {transform_indices = @transform_9, window_bounds = array<i64: 16, 128>}]} {
    %cst = arith.constant 0.000000e+00 : bf16
    %0 = vector.broadcast %cst : bf16 to vector<16x128xbf16>
    %c0 = arith.constant 0 : index
    %c0_0 = arith.constant 0 : index
    %1 = vector.load %arg11[%c0, %c0_0] : memref<16x128xbf16, #tpu.memory_space<vmem>>, vector<16x128xbf16>
    tpu.vector_store %arg11[%c0, %c0_0], %0 {strides = array<i32>} : memref<16x128xbf16, #tpu.memory_space<vmem>>, vector<16x128xbf16>,
    %c0_1 = arith.constant 0 : index
    %c0_2 = arith.constant 0 : index
    %2 = vector.load %arg1[%c0_1, %c0_2] : memref<16x4xf32, #tpu.memory_space<vmem>>, vector<16x4xf32>
    %3 = arith.truncf %2 : vector<16x4xf32> to vector<16x4xbf16>
    %c0_3 = arith.constant 0 : index
    %c0_4 = arith.constant 0 : index
    %4 = vector.load %arg11[%c0_3, %c0_4] : memref<16x128xbf16, #tpu.memory_space<vmem>>, vector<16x4xbf16>
    tpu.vector_store %arg11[%c0_3, %c0_4], %3 {strides = array<i32>} : memref<16x128xbf16, #tpu.memory_space<vmem>>, vector<16x4xbf16>,
    %c0_5 = arith.constant 0 : index
    %c0_6 = arith.constant 0 : index
    %5 = vector.load %arg11[%c0_5, %c0_6] : memref<16x128xbf16, #tpu.memory_space<vmem>>, vector<16x128xbf16>
    %c0_7 = arith.constant 0 : index
    %c0_8 = arith.constant 0 : index
    %6 = vector.load %arg2[%c0_7, %c0_8] : memref<128x512xbf16, #tpu.memory_space<vmem>>, vector<128x512xbf16>
    %cst_9 = arith.constant dense<0.000000e+00> : vector<16x512xf32>
    %7 = tpu.matmul %5, %6, %cst_9 {dimension_numbers = #tpu.dot_dimension_numbers<[1], [0], [0], [1], [0, 0, 1, 1], [], []>} : vector<16x128xbf16>, vector<128x512xbf16>, vector<16x512xf32> -> vector<16x512xf32>
    %c0_10 = arith.constant 0 : index
    %c0_11 = arith.constant 0 : index
    %8 = vector.load %arg3[%c0_10, %c0_11] : memref<1x512xf32, #tpu.memory_space<vmem>>, vector<1x512xf32>
    %9 = vector.broadcast %8 : vector<1x512xf32> to vector<16x512xf32>
    %10 = arith.addf %7, %9 : vector<16x512xf32>
    %11 = arith.truncf %10 : vector<16x512xf32> to vector<16x512xbf16>
    %cst_12 = arith.constant 0.000000e+00 : bf16
    %12 = vector.broadcast %cst_12 : bf16 to vector<16x512xbf16>
    %13 = arith.maximumf %11, %12 : vector<16x512xbf16>
    %c0_13 = arith.constant 0 : index
    %c0_14 = arith.constant 0 : index
    %14 = vector.load %arg4[%c0_13, %c0_14] : memref<512x256xbf16, #tpu.memory_space<vmem>>, vector<512x256xbf16>
    %cst_15 = arith.constant dense<0.000000e+00> : vector<16x256xf32>
    %15 = tpu.matmul %13, %14, %cst_15 {dimension_numbers = #tpu.dot_dimension_numbers<[1], [0], [0], [1], [0, 0, 1, 1], [], []>} : vector<16x512xbf16>, vector<512x256xbf16>, vector<16x256xf32> -> vector<16x256xf32>
    %c0_16 = arith.constant 0 : index
    %c0_17 = arith.constant 0 : index
    %16 = vector.load %arg5[%c0_16, %c0_17] : memref<1x256xf32, #tpu.memory_space<vmem>>, vector<1x256xf32>
    %17 = vector.broadcast %16 : vector<1x256xf32> to vector<16x256xf32>
    %18 = arith.addf %15, %17 : vector<16x256xf32>
    %19 = arith.truncf %18 : vector<16x256xf32> to vector<16x256xbf16>
    %cst_18 = arith.constant 0.000000e+00 : bf16
    %20 = vector.broadcast %cst_18 : bf16 to vector<16x256xbf16>
    %21 = arith.maximumf %19, %20 : vector<16x256xbf16>
    %c0_19 = arith.constant 0 : index
    %c0_20 = arith.constant 0 : index
    %22 = vector.load %arg6[%c0_19, %c0_20] : memref<256x256xbf16, #tpu.memory_space<vmem>>, vector<256x256xbf16>
    %cst_21 = arith.constant dense<0.000000e+00> : vector<16x256xf32>
    %23 = tpu.matmul %21, %22, %cst_21 {dimension_numbers = #tpu.dot_dimension_numbers<[1], [0], [0], [1], [0, 0, 1, 1], [], []>} : vector<16x256xbf16>, vector<256x256xbf16>, vector<16x256xf32> -> vector<16x256xf32>
    %c0_22 = arith.constant 0 : index
    %c0_23 = arith.constant 0 : index
    %24 = vector.load %arg7[%c0_22, %c0_23] : memref<1x256xf32, #tpu.memory_space<vmem>>, vector<1x256xf32>
    %25 = vector.broadcast %24 : vector<1x256xf32> to vector<16x256xf32>
    %26 = arith.addf %23, %25 : vector<16x256xf32>
    %27 = arith.truncf %26 : vector<16x256xf32> to vector<16x256xbf16>
    %cst_24 = arith.constant 0.000000e+00 : bf16
    %28 = vector.broadcast %cst_24 : bf16 to vector<16x256xbf16>
    %29 = arith.maximumf %27, %28 : vector<16x256xbf16>
    %c0_25 = arith.constant 0 : index
    %c0_26 = arith.constant 0 : index
    %30 = vector.load %arg8[%c0_25, %c0_26] : memref<256x128xbf16, #tpu.memory_space<vmem>>, vector<256x128xbf16>
    %cst_27 = arith.constant dense<0.000000e+00> : vector<16x128xf32>
    %31 = tpu.matmul %29, %30, %cst_27 {dimension_numbers = #tpu.dot_dimension_numbers<[1], [0], [0], [1], [0, 0, 1, 1], [], []>} : vector<16x256xbf16>, vector<256x128xbf16>, vector<16x128xf32> -> vector<16x128xf32>
    %c0_28 = arith.constant 0 : index
    %c0_29 = arith.constant 0 : index
    %32 = vector.load %arg9[%c0_28, %c0_29] : memref<1x128xf32, #tpu.memory_space<vmem>>, vector<1x128xf32>
    %33 = vector.broadcast %32 : vector<1x128xf32> to vector<16x128xf32>
    %34 = arith.addf %31, %33 : vector<16x128xf32>
    %35 = arith.truncf %34 : vector<16x128xf32> to vector<16x128xbf16>
    %c0_30 = arith.constant 0 : index
    %c0_31 = arith.constant 0 : index
    %36 = vector.load %arg10[%c0_30, %c0_31] : memref<16x128xbf16, #tpu.memory_space<vmem>>, vector<16x128xbf16>
    tpu.vector_store %arg10[%c0_30, %c0_31], %35 {strides = array<i32>} : memref<16x128xbf16, #tpu.memory_space<vmem>>, vector<16x128xbf16>,
    return
  }
  func.func @transform_0(%arg0: i32) -> (i32, i32) {
    %c0_i32 = arith.constant 0 : i32
    %c0_i32_0 = arith.constant 0 : i32
    return %arg0, %c0_i32 : i32, i32
  }
  func.func @transform_1(%arg0: i32) -> (i32, i32) {
    %c0_i32 = arith.constant 0 : i32
    %c0_i32_0 = arith.constant 0 : i32
    %c0_i32_1 = arith.constant 0 : i32
    return %c0_i32, %c0_i32_0 : i32, i32
  }
  func.func @transform_2(%arg0: i32) -> (i32, i32) {
    %c0_i32 = arith.constant 0 : i32
    %c0_i32_0 = arith.constant 0 : i32
    %c0_i32_1 = arith.constant 0 : i32
    return %c0_i32, %c0_i32_0 : i32, i32
  }
  func.func @transform_3(%arg0: i32) -> (i32, i32) {
    %c0_i32 = arith.constant 0 : i32
    %c0_i32_0 = arith.constant 0 : i32
    %c0_i32_1 = arith.constant 0 : i32
    return %c0_i32, %c0_i32_0 : i32, i32
  }
  func.func @transform_4(%arg0: i32) -> (i32, i32) {
    %c0_i32 = arith.constant 0 : i32
    %c0_i32_0 = arith.constant 0 : i32
    %c0_i32_1 = arith.constant 0 : i32
    return %c0_i32, %c0_i32_0 : i32, i32
  }
  func.func @transform_5(%arg0: i32) -> (i32, i32) {
    %c0_i32 = arith.constant 0 : i32
    %c0_i32_0 = arith.constant 0 : i32
    %c0_i32_1 = arith.constant 0 : i32
    return %c0_i32, %c0_i32_0 : i32, i32
  }
  func.func @transform_6(%arg0: i32) -> (i32, i32) {
    %c0_i32 = arith.constant 0 : i32
    %c0_i32_0 = arith.constant 0 : i32
    %c0_i32_1 = arith.constant 0 : i32
    return %c0_i32, %c0_i32_0 : i32, i32
  }
  func.func @transform_7(%arg0: i32) -> (i32, i32) {
    %c0_i32 = arith.constant 0 : i32
    %c0_i32_0 = arith.constant 0 : i32
    %c0_i32_1 = arith.constant 0 : i32
    return %c0_i32, %c0_i32_0 : i32, i32
  }
  func.func @transform_8(%arg0: i32) -> (i32, i32) {
    %c0_i32 = arith.constant 0 : i32
    %c0_i32_0 = arith.constant 0 : i32
    %c0_i32_1 = arith.constant 0 : i32
    return %c0_i32, %c0_i32_0 : i32, i32
  }
  func.func @transform_9(%arg0: i32) -> (i32, i32) {
    %c0_i32 = arith.constant 0 : i32
    %c0_i32_0 = arith.constant 0 : i32
    return %arg0, %c0_i32 : i32, i32
  }
}

</mosaic_0001>

<bundles_post_ra>
// kernel: qnetwork_forward.1
= control target key start
LH: loop header
LB: loop body
LE: loop exit
PB: predicated region body
PF: predicated region fallthrough
CT: control target
= control target key end

     0   :  { %14 = vsyncpa [#allocation4], 0  ;;  %s2000_s0 = inlined_call_operand.vmem [shape: f32[16,4], index: 0, kind: input, shape index: {}]   ;;  %s2001_s1 = inlined_call_operand.hbm [shape: bf16[128,512], index: 1, kind: input, shape index: {}]   ;;  %s2002_s2 = inlined_call_operand.vmem [shape: f32[1,512], index: 2, kind: input, shape index: {}]   ;;  %s2003_s3 = inlined_call_operand.hbm [shape: bf16[512,256], index: 3, kind: input, shape index: {}]   ;;  %s2004_s4 = inlined_call_operand.vmem [shape: f32[1,256], index: 4, kind: input, shape index: {}]   ;;  %s2005_s5 = inlined_call_operand.hbm [shape: bf16[256,256], index: 5, kind: input, shape index: {}]   ;;  %s2006_s6 = inlined_call_operand.vmem [shape: f32[1,256], index: 6, kind: input, shape index: {}]   ;;  %s2007_s7 = inlined_call_operand.hbm [shape: bf16[256,128], index: 7, kind: input, shape index: {}]   ;;  %s2008_s8 = inlined_call_operand.vmem [shape: f32[1,128], index: 8, kind: input, shape index: {}]   ;;  %s2009_s9 = inlined_call_operand.vmem [shape: bf16[16,128], index: 9, kind: output, shape index: {}]  }
   0x1   :  { %15 = vsyncpa [#allocation6], 0 }
   0x2   :  { %16 = vsyncpa [#allocation9], 0  ;;  %s1830_s30 = smov [#allocation5]   ;;  %s1736_s13 = scalar_lea.hbm %s2003_s3, 8192 }
   0x3   :  { %s38_s10 = sshll.u32 %s1830_s30, 4  ;;  %p1737_p0 = scmp.ne.s32.totalorder %s2003_s3, %s1736_s13  ;;  %s39_s10 = int_to_ptr.vmem [resolvable:$true] %s38_s10 }
   0x4   :  { %p1740_p1 = scmp.lt.u32.totalorder %s1736_s13, %s2003_s3 }
   0x6   :  { %p1742_p2 = pnand %p1740_p1, %p1737_p0 }
   0x8   :  { %1745 = shalt.err (!%p1742_p2)
}
   0x9   :  { %s1746_s18 = scalar_lea.vmem %s39_s10, 8192  ;;  %p1751_p4 = scmp.lt.s32.totalorder %s39_s10, %s39_s10 }
   0xa   :  { %p1747_p3 = scmp.ne.s32.totalorder %s39_s10, %s1746_s18  ;;  %p1752_p5 = scmp.lt.s32.totalorder %s1746_s18, %s1746_s18 }
   0xc   :  { %p1753_p6 = por %p1752_p5, %p1751_p4 }
   0xe   :  { %p1754_p7 = pnand %p1753_p6, %p1747_p3 }
  0x10   :  { %1757 = shalt.err (!%p1754_p7)
}
  0x11   :  { %s1831_s19 = smov 128   ;;  %s1832_s20 = smov 8  }
  0x12   :  { %44 = dma.hbm_to_vmem [thread:$0]  %s2003_s3, 8192, %s39_s10, [#allocation6], %s1831_s19, %s1831_s19, %s1832_s20  }
  0x13   :  { %s1833_s23 = smov [#allocation3]   ;;  %s1758_s27 = scalar_lea.hbm %s2001_s1, 4096 }
  0x14   :  { %s24_s24 = sshll.u32 %s1833_s23, 4  ;;  %p1759_p8 = scmp.ne.s32.totalorder %s2001_s1, %s1758_s27  ;;  %s25_s24 = int_to_ptr.vmem [resolvable:$true] %s24_s24 }
  0x15   :  { %p1762_p9 = scmp.lt.u32.totalorder %s1758_s27, %s2001_s1 }
  0x17   :  { %p1764_p10 = pnand %p1762_p9, %p1759_p8 }
  0x19   :  { %1767 = shalt.err (!%p1764_p10)
}
  0x1a   :  { %s1768_s12 = scalar_lea.vmem %s25_s24, 4096  ;;  %p1773_p12 = scmp.lt.s32.totalorder %s25_s24, %s25_s24 }
  0x1b   :  { %p1769_p11 = scmp.ne.s32.totalorder %s25_s24, %s1768_s12  ;;  %p1774_p13 = scmp.lt.s32.totalorder %s1768_s12, %s1768_s12 }
  0x1d   :  { %p1775_p0 = por %p1774_p13, %p1773_p12 }
  0x1f   :  { %p1776_p1 = pnand %p1775_p0, %p1769_p11 }
  0x21   :  { %1779 = shalt.err (!%p1776_p1)
}
  0x22   :  { %s1834_s3 = smov 256   ;;  %s1835_s10 = smov 16  }
  0x23   :  { %30 = dma.hbm_to_vmem [thread:$0]  %s2001_s1, 4096, %s25_s24, [#allocation4], %s1834_s3, %s1834_s3, %s1835_s10  }
  0x24   :  { %s1836_s15 = smov [#allocation7]   ;;  %s1837_s17 = smov [#allocation8]  }
  0x25   :  { %s52_s16 = sshll.u32 %s1836_s15, 4  ;;  %s66_s18 = sshll.u32 %s1837_s17, 4  ;;  %s53_s16 = int_to_ptr.vmem [resolvable:$true] %s52_s16  ;;  %s1918_s18 = int_to_ptr.vmem [resolvable:$true] %s66_s18 }
  0x26   :  { %s1780_s23 = scalar_lea.hbm %s2005_s5, 4096 }
  0x27   :  { %p1781_p2 = scmp.ne.s32.totalorder %s2005_s5, %s1780_s23  ;;  %p1784_p3 = scmp.lt.u32.totalorder %s1780_s23, %s2005_s5 }
  0x29   :  { %p1786_p4 = pnand %p1784_p3, %p1781_p2 }
  0x2b   :  { %1789 = shalt.err (!%p1786_p4)
}
  0x2c   :  { %s1790_s1 = scalar_lea.vmem %s53_s16, 4096  ;;  %p1795_p6 = scmp.lt.s32.totalorder %s53_s16, %s53_s16 }
  0x2d   :  { %p1791_p5 = scmp.ne.s32.totalorder %s53_s16, %s1790_s1  ;;  %p1796_p7 = scmp.lt.s32.totalorder %s1790_s1, %s1790_s1 }
  0x2f   :  { %p1797_p8 = por %p1796_p7, %p1795_p6 }
  0x31   :  { %p1798_p9 = pnand %p1797_p8, %p1791_p5 }
  0x33   :  { %1801 = shalt.err (!%p1798_p9)
}
  0x34   :  { %58 = dma.hbm_to_vmem [thread:$0]  %s2005_s5, 4096, %s53_s16, [#allocation6], %s1831_s19, %s1831_s19, %s1832_s20  }
  0x35   :  { %s1802_s12 = scalar_lea.hbm %s2007_s7, 2048 }
  0x36   :  { %p1803_p10 = scmp.ne.s32.totalorder %s2007_s7, %s1802_s12  ;;  %p1806_p11 = scmp.lt.u32.totalorder %s1802_s12, %s2007_s7 }
  0x38   :  { %p1808_p12 = pnand %p1806_p11, %p1803_p10 }
  0x3a   :  { %1811 = shalt.err (!%p1808_p12)
}
  0x3b   :  { %s1812_s15 = scalar_lea.vmem %s1918_s18, 2048  ;;  %p1817_p0 = scmp.lt.s32.totalorder %s1918_s18, %s1918_s18 }
  0x3c   :  { %p1813_p13 = scmp.ne.s32.totalorder %s1918_s18, %s1812_s15  ;;  %p1818_p1 = scmp.lt.s32.totalorder %s1812_s15, %s1812_s15 }
  0x3e   :  { %p1819_p2 = por %p1818_p1, %p1817_p0 }
  0x40   :  { %p1820_p3 = pnand %p1819_p2, %p1813_p13 }
  0x42   :  { %1823 = shalt.err (!%p1820_p3)
}
  0x43   :  { %s1838_s5 = smov 64   ;;  %s1839_s19 = smov 4  }
  0x44   :  { %72 = dma.hbm_to_vmem [thread:$0]  %s2007_s7, 2048, %s1918_s18, [#allocation9], %s1838_s5, %s1838_s5, %s1839_s19  }
  0x45   :  { %1824 = dma.done.wait [#allocation4], 4096  }
  0x46   :  { %1825 = vsyncadd [#allocation4], 4294963200 }
  0x47   :  { %1826 = dma.done.wait [#allocation6], 12288  }
  0x48   :  { %1827 = vsyncadd [#allocation6], 4294955008 }
  0x49   :  { %1828 = dma.done.wait [#allocation9], 2048  }
  0x4a   :  { %1829 = vsyncadd [#allocation9], 4294965248  ;;  %v1840_v0 = vmov 0   ;;  %v1528_v1 = vld [vmem:[#allocation3 + $0x4] ss:$16 sps:$4 sm:$0xff]   ;;  %v89_v10 = vld [vmem:[%s2000_s0] sm:$0xff] }
  0x4b   :  { %341 = vmatprep.mubr.bf16.mxu0 %v1840_v0  ;;  %88 = vst [vmem:[#allocation2] sm:$0xff] %v1840_v0  ;;  %384 = vmatprep.mubr.bf16.mxu1 %v1840_v0  ;;  %v1530_v2 = vld [vmem:[#allocation3] ss:$16 sps:$4 sm:$0xff]   ;;  %v1531_v3 = vld [vmem:[#allocation3 + $0x24] ss:$16 sps:$4 sm:$0xff]   ;;  %vm92_vm0 = vcmask 31744  }
  0x4c   :  { %309 = vmatprep.subr.bf16.mxu0 %v1528_v1  ;;  %v1533_v4 = vld [vmem:[#allocation3 + $0x20] ss:$16 sps:$4 sm:$0xff]   ;;  %v1534_v5 = vld [vmem:[#allocation3 + $0x44] ss:$16 sps:$4 sm:$0xff]   ;;  %v1552_v13 = vld [vmem:[#allocation3 + $0xc] ss:$16 sps:$4 sm:$0xff]  }
  0x4d   :  { %310 = vmatpush1.bf16.msra.mxu0 %v1530_v2  ;;  %v1536_v6 = vld [vmem:[#allocation3 + $0x40] ss:$16 sps:$4 sm:$0xff]   ;;  %v1537_v7 = vld [vmem:[#allocation3 + $0x64] ss:$16 sps:$4 sm:$0xff]   ;;  %v1554_v14 = vld [vmem:[#allocation3 + $0x8] ss:$16 sps:$4 sm:$0xff]   ;;  %352 = vmatprep.subr.bf16.mxu1 %v1552_v13 }
  0x4e   :  { %311 = vmatprep.subr.bf16.mxu0 %v1531_v3  ;;  %v1539_v8 = vld [vmem:[#allocation3 + $0x60] ss:$16 sps:$4 sm:$0xff]   ;;  %v1540_v9 = vld [vmem:[#allocation3 + $0x84] ss:$16 sps:$4 sm:$0xff]   ;;  %v1555_v15 = vld [vmem:[#allocation3 + $0x2c] ss:$16 sps:$4 sm:$0xff]   ;;  %353 = vmatpush1.bf16.msra.mxu1 %v1554_v14 }
  0x4f   :  { %v90_v11 = vld [vmem:[%s2000_s0 + $0x8] sm:$0xff]  ;;  %v1557_v17 = vld [vmem:[#allocation3 + $0x28] ss:$16 sps:$4 sm:$0xff]   ;;  %354 = vmatprep.subr.bf16.mxu1 %v1555_v15  ;;  %v1558_v19 = vld [vmem:[#allocation3 + $0x4c] ss:$16 sps:$4 sm:$0xff]  }
  0x50   :  { %v91_v12 = vpack.c.bf16 %v90_v11, %v89_v10  ;;  %v1542_v16 = vld [vmem:[#allocation3 + $0x80] ss:$16 sps:$4 sm:$0xff]   ;;  %v1543_v18 = vld [vmem:[#allocation3 + $0xa4] ss:$16 sps:$4 sm:$0xff]   ;;  %v1560_v21 = vld [vmem:[#allocation3 + $0x48] ss:$16 sps:$4 sm:$0xff]  }
  0x51   :  { %312 = vmatpush1.bf16.msra.mxu0 %v1533_v4  ;;  %v1545_v20 = vld [vmem:[#allocation3 + $0xa0] ss:$16 sps:$4 sm:$0xff]   ;;  %v1546_v22 = vld [vmem:[#allocation3 + $0xc4] ss:$16 sps:$4 sm:$0xff]   ;;  %v1561_v23 = vld [vmem:[#allocation3 + $0x6c] ss:$16 sps:$4 sm:$0xff]  }
  0x52   :  { %313 = vmatprep.subr.bf16.mxu0 %v1534_v5  ;;  %93 = vst.msk [vmem:[#allocation2] sm:$0xff] %vm92_vm0, %v91_v12  ;;  %355 = vmatpush1.bf16.msra.mxu1 %v1557_v17  ;;  %v1548_v24 = vld [vmem:[#allocation3 + $0xc0] ss:$16 sps:$4 sm:$0xff]   ;;  %v1563_v25 = vld [vmem:[#allocation3 + $0x68] ss:$16 sps:$4 sm:$0xff]  }
  0x53   :  { %356 = vmatprep.subr.bf16.mxu1 %v1558_v19  ;;  %v1549_v26 = vld [vmem:[#allocation3 + $0xe4] ss:$16 sps:$4 sm:$0xff]   ;;  %v1564_v27 = vld [vmem:[#allocation3 + $0x8c] ss:$16 sps:$4 sm:$0xff]   ;;  %v1551_v28 = vld [vmem:[#allocation3 + $0xe0] ss:$16 sps:$4 sm:$0xff]  }
  0x54   :  { %v1566_v29 = vld [vmem:[#allocation3 + $0x88] ss:$16 sps:$4 sm:$0xff]   ;;  %v1567_v30 = vld [vmem:[#allocation3 + $0xac] ss:$16 sps:$4 sm:$0xff]  }
  0x55   :  { %314 = vmatpush1.bf16.msra.mxu0 %v1536_v6  ;;  %v1578_v31 = vld [vmem:[#allocation5 + $0x4] ss:$8 sps:$4 sm:$0xff]   ;;  %v1569_v32 = vld [vmem:[#allocation3 + $0xa8] ss:$16 sps:$4 sm:$0xff]   ;;  %v1581_v36 = vld [vmem:[#allocation5 + $0x14] ss:$8 sps:$4 sm:$0xff]  }
  0x56   :  { %315 = vmatprep.subr.bf16.mxu0 %v1537_v7  ;;  %357 = vmatpush1.bf16.msra.mxu1 %v1560_v21  ;;  %v1576_v34 = vld [vmem:[#allocation5] ss:$8 sps:$4 sm:$0xff]   ;;  %v1570_v35 = vld [vmem:[#allocation3 + $0xcc] ss:$16 sps:$4 sm:$0xff]   ;;  %v1579_v38 = vld [vmem:[#allocation5 + $0x10] ss:$8 sps:$4 sm:$0xff]  }
  0x57   :  { %358 = vmatprep.subr.bf16.mxu1 %v1561_v23  ;;  %v1572_v37 = vld [vmem:[#allocation3 + $0xc8] ss:$16 sps:$4 sm:$0xff]   ;;  %v1573_v39 = vld [vmem:[#allocation3 + $0xec] ss:$16 sps:$4 sm:$0xff]  }
  0x58   :  { %v1584_v40 = vld [vmem:[#allocation5 + $0x24] ss:$8 sps:$4 sm:$0xff]   ;;  %v1575_v41 = vld [vmem:[#allocation3 + $0xe8] ss:$16 sps:$4 sm:$0xff]   ;;  %v1587_v43 = vld [vmem:[#allocation5 + $0x34] ss:$8 sps:$4 sm:$0xff]  }
  0x59   :  { %316 = vmatpush1.bf16.msra.mxu0 %v1539_v8  ;;  %v94_v33 = vld [vmem:[#allocation2] sm:$0xff]  ;;  %v1582_v42 = vld [vmem:[#allocation5 + $0x20] ss:$8 sps:$4 sm:$0xff]   ;;  %v1590_v45 = vld [vmem:[#allocation5 + $0x44] ss:$8 sps:$4 sm:$0xff]  }
  0x5a   :  { %317 = vmatprep.subr.bf16.mxu0 %v1540_v9  ;;  %359 = vmatpush1.bf16.msra.mxu1 %v1563_v25  ;;  %v1585_v44 = vld [vmem:[#allocation5 + $0x30] ss:$8 sps:$4 sm:$0xff]   ;;  %v1588_v46 = vld [vmem:[#allocation5 + $0x40] ss:$8 sps:$4 sm:$0xff]   ;;  %v1593_v47 = vld [vmem:[#allocation5 + $0x54] ss:$8 sps:$4 sm:$0xff]  }
  0x5b   :  { %360 = vmatprep.subr.bf16.mxu1 %v1564_v27  ;;  %v1591_v48 = vld [vmem:[#allocation5 + $0x50] ss:$8 sps:$4 sm:$0xff]   ;;  %v1596_v49 = vld [vmem:[#allocation5 + $0x64] ss:$8 sps:$4 sm:$0xff]   ;;  %v1594_v50 = vld [vmem:[#allocation5 + $0x60] ss:$8 sps:$4 sm:$0xff]  }
  0x5c   :  { %v1599_v51 = vld [vmem:[#allocation5 + $0x74] ss:$8 sps:$4 sm:$0xff]   ;;  %v1597_v52 = vld [vmem:[#allocation5 + $0x70] ss:$8 sps:$4 sm:$0xff]   ;;  %v1602_v53 = vld [vmem:[#allocation5 + $0x84] ss:$8 sps:$4 sm:$0xff]  }
  0x5d   :  { %318 = vmatpush1.bf16.msra.mxu0 %v1542_v16  ;;  %v1600_v54 = vld [vmem:[#allocation5 + $0x80] ss:$8 sps:$4 sm:$0xff]   ;;  %v1605_v55 = vld [vmem:[#allocation5 + $0x94] ss:$8 sps:$4 sm:$0xff]   ;;  %v1603_v56 = vld [vmem:[#allocation5 + $0x90] ss:$8 sps:$4 sm:$0xff]  }
  0x5e   :  { %319 = vmatprep.subr.bf16.mxu0 %v1543_v18  ;;  %361 = vmatpush1.bf16.msra.mxu1 %v1566_v29  ;;  %v1608_v57 = vld [vmem:[#allocation5 + $0xa4] ss:$8 sps:$4 sm:$0xff]   ;;  %v1606_v58 = vld [vmem:[#allocation5 + $0xa0] ss:$8 sps:$4 sm:$0xff]   ;;  %v1611_v59 = vld [vmem:[#allocation5 + $0xb4] ss:$8 sps:$4 sm:$0xff]   ;;  %v129_v29 = vlaneseq }
  0x5f   :  { %362 = vmatprep.subr.bf16.mxu1 %v1567_v30  ;;  %v1609_v60 = vld [vmem:[#allocation5 + $0xb0] ss:$8 sps:$4 sm:$0xff]   ;;  %v1614_v61 = vld [vmem:[#allocation5 + $0xc4] ss:$8 sps:$4 sm:$0xff]   ;;  %v1612_v62 = vld [vmem:[#allocation5 + $0xc0] ss:$8 sps:$4 sm:$0xff]  }
  0x60   :  { %v1617_v63 = vld [vmem:[#allocation5 + $0xd4] ss:$8 sps:$4 sm:$0xff]   ;;  %v1615_v1 = vld [vmem:[#allocation5 + $0xd0] ss:$8 sps:$4 sm:$0xff]   ;;  %v1620_v2 = vld [vmem:[#allocation5 + $0xe4] ss:$8 sps:$4 sm:$0xff]  }
  0x61   :  { %320 = vmatpush1.bf16.msra.mxu0 %v1545_v20  ;;  %v1618_v3 = vld [vmem:[#allocation5 + $0xe0] ss:$8 sps:$4 sm:$0xff]   ;;  %v1623_v4 = vld [vmem:[#allocation5 + $0xf4] ss:$8 sps:$4 sm:$0xff]   ;;  %v1621_v5 = vld [vmem:[#allocation5 + $0xf0] ss:$8 sps:$4 sm:$0xff]  }
  0x62   :  { %321 = vmatprep.subr.bf16.mxu0 %v1546_v22  ;;  %363 = vmatpush1.bf16.msra.mxu1 %v1569_v32  ;;  %v1626_v6 = vld [vmem:[#allocation5 + $0x104] ss:$8 sps:$4 sm:$0xff]   ;;  %v1672_v7 = vld [vmem:[#allocation7] ss:$8 sps:$4 sm:$0xff]   ;;  %v1677_v9 = vld [vmem:[#allocation7 + $0x14] ss:$8 sps:$4 sm:$0xff]  }
  0x63   :  { %364 = vmatprep.subr.bf16.mxu1 %v1570_v35  ;;  %v1674_v8 = vld [vmem:[#allocation7 + $0x4] ss:$8 sps:$4 sm:$0xff]   ;;  %v1675_v10 = vld [vmem:[#allocation7 + $0x10] ss:$8 sps:$4 sm:$0xff]   ;;  %v1678_v12 = vld [vmem:[#allocation7 + $0x20] ss:$8 sps:$4 sm:$0xff]  }
  0x64   :  { %v1680_v11 = vld [vmem:[#allocation7 + $0x24] ss:$8 sps:$4 sm:$0xff]   ;;  %v1683_v13 = vld [vmem:[#allocation7 + $0x34] ss:$8 sps:$4 sm:$0xff]   ;;  %v1681_v14 = vld [vmem:[#allocation7 + $0x30] ss:$8 sps:$4 sm:$0xff]  }
  0x65   :  { %322 = vmatpush1.bf16.msra.mxu0 %v1548_v24  ;;  %v1686_v15 = vld [vmem:[#allocation7 + $0x44] ss:$8 sps:$4 sm:$0xff]   ;;  %v1684_v16 = vld [vmem:[#allocation7 + $0x40] ss:$8 sps:$4 sm:$0xff]   ;;  %v1689_v17 = vld [vmem:[#allocation7 + $0x54] ss:$8 sps:$4 sm:$0xff]  }
  0x66   :  { %323 = vmatprep.subr.bf16.mxu0 %v1549_v26  ;;  %365 = vmatpush1.bf16.msra.mxu1 %v1572_v37  ;;  %v1687_v18 = vld [vmem:[#allocation7 + $0x50] ss:$8 sps:$4 sm:$0xff]   ;;  %v1692_v19 = vld [vmem:[#allocation7 + $0x64] ss:$8 sps:$4 sm:$0xff]   ;;  %v1690_v20 = vld [vmem:[#allocation7 + $0x60] ss:$8 sps:$4 sm:$0xff]  }
  0x67   :  { %366 = vmatprep.subr.bf16.mxu1 %v1573_v39  ;;  %v1695_v21 = vld [vmem:[#allocation7 + $0x74] ss:$8 sps:$4 sm:$0xff]   ;;  %v1693_v22 = vld [vmem:[#allocation7 + $0x70] ss:$8 sps:$4 sm:$0xff]   ;;  %v1698_v23 = vld [vmem:[#allocation7 + $0x84] ss:$8 sps:$4 sm:$0xff]  }
  0x68   :  { %v1696_v24 = vld [vmem:[#allocation7 + $0x80] ss:$8 sps:$4 sm:$0xff]   ;;  %v1701_v25 = vld [vmem:[#allocation7 + $0x94] ss:$8 sps:$4 sm:$0xff]   ;;  %v1699_v26 = vld [vmem:[#allocation7 + $0x90] ss:$8 sps:$4 sm:$0xff]  }
  0x69   :  { %324 = vmatpush1.bf16.msra.mxu0 %v1551_v28  ;;  %v1704_v27 = vld [vmem:[#allocation7 + $0xa4] ss:$8 sps:$4 sm:$0xff]   ;;  %v1702_v28 = vld [vmem:[#allocation7 + $0xa0] ss:$8 sps:$4 sm:$0xff]   ;;  %v1707_v30 = vld [vmem:[#allocation7 + $0xb4] ss:$8 sps:$4 sm:$0xff]  }
  0x6a   :  { %799 = vmatprep.subr.bf16.mxu0 %v1578_v31  ;;  %367 = vmatpush1.bf16.msra.mxu1 %v1575_v41  ;;  %v1705_v31 = vld [vmem:[#allocation7 + $0xb0] ss:$8 sps:$4 sm:$0xff]   ;;  %v130_v32 = vshrl.u32 %v129_v29, 7  ;;  %v1662_v29 = vld [vmem:[#allocation5 + $0x1c4] ss:$8 sps:$4 sm:$0xff]  }
  0x6b   :  { %1093 = vmatprep.subr.bf16.mxu1 %v1674_v8  ;;  %v127_v37 = vld [vmem:[%s2002_s2] sm:$0xf]  ;;  %v1635_v8 = vld [vmem:[#allocation5 + $0x134] ss:$8 sps:$4 sm:$0xff]  }
  0x6c   :  { %342 = vmatmul.mubr.bf16.vlgmr.msra.gmra.mrb[0].mxu0 %v94_v33  ;;  %v1961_v35 = vsub.s32 0, %v130_v32  ;;  %v1711_v39 = vld [vmem:[#allocation7 + $0xd0] ss:$8 sps:$4 sm:$0xff]  }
  0x6d   :  { %800 = vmatpush1.bf16.msra.mxu0 %v1576_v34  ;;  %385 = vmatmul.mubr.bf16.vlgmr.msra.gmra.mrb[0].mxu1 %v94_v33  ;;  %v1710_v33 = vld [vmem:[#allocation7 + $0xc4] ss:$8 sps:$4 sm:$0xff]   ;;  %v1708_v34 = vld [vmem:[#allocation7 + $0xc0] ss:$8 sps:$4 sm:$0xff]  }
  0x6e   :  { %801 = vmatprep.subr.bf16.mxu0 %v1581_v36  ;;  %1094 = vmatpush1.bf16.msra.mxu1 %v1672_v7  ;;  %v1713_v36 = vld [vmem:[#allocation7 + $0xd4] ss:$8 sps:$4 sm:$0xff]  }
  0x6f   :  { %1095 = vmatprep.subr.bf16.mxu1 %v1677_v9 }
  0x71   :  { %802 = vmatpush1.bf16.msra.mxu0 %v1579_v38  ;;  %v1966_v38 = vsub.s32 1, %v130_v32 }
  0x72   :  { %803 = vmatprep.subr.bf16.mxu0 %v1584_v40  ;;  %1096 = vmatpush1.bf16.msra.mxu1 %v1675_v10  ;;  %v132_v40 = vrot.slane %v127_v37, %v1961_v35 }
  0x73   :  { %1097 = vmatprep.subr.bf16.mxu1 %v1680_v11  ;;  %v1633_v11 = vld [vmem:[#allocation5 + $0x130] ss:$8 sps:$4 sm:$0xff]  }
  0x75   :  { %804 = vmatpush1.bf16.msra.mxu0 %v1582_v42  ;;  %v136_v42 = vrot.slane %v127_v37, %v1966_v38 }
  0x76   :  { %805 = vmatprep.subr.bf16.mxu0 %v1587_v43  ;;  %1098 = vmatpush1.bf16.msra.mxu1 %v1678_v12 }
  0x77   :  { %1099 = vmatprep.subr.bf16.mxu1 %v1683_v13  ;;  %v1638_v13 = vld [vmem:[#allocation5 + $0x144] ss:$8 sps:$4 sm:$0xff]  }
  0x79   :  { %806 = vmatpush1.bf16.msra.mxu0 %v1585_v44 }
  0x7a   :  { %807 = vmatprep.subr.bf16.mxu0 %v1590_v45  ;;  %1100 = vmatpush1.bf16.msra.mxu1 %v1681_v14  ;;  %v1636_v14 = vld [vmem:[#allocation5 + $0x140] ss:$8 sps:$4 sm:$0xff]  }
  0x7b   :  { %1101 = vmatprep.subr.bf16.mxu1 %v1686_v15  ;;  %v1641_v15 = vld [vmem:[#allocation5 + $0x154] ss:$8 sps:$4 sm:$0xff]  }
  0x7d   :  { %808 = vmatpush1.bf16.msra.mxu0 %v1588_v46 }
  0x7e   :  { %809 = vmatprep.subr.bf16.mxu0 %v1593_v47  ;;  %1102 = vmatpush1.bf16.msra.mxu1 %v1684_v16  ;;  %v1639_v16 = vld [vmem:[#allocation5 + $0x150] ss:$8 sps:$4 sm:$0xff]  }
  0x7f   :  { %1103 = vmatprep.subr.bf16.mxu1 %v1689_v17  ;;  %v1644_v17 = vld [vmem:[#allocation5 + $0x164] ss:$8 sps:$4 sm:$0xff]  }
  0x81   :  { %810 = vmatpush1.bf16.msra.mxu0 %v1591_v48 }
  0x82   :  { %811 = vmatprep.subr.bf16.mxu0 %v1596_v49  ;;  %1104 = vmatpush1.bf16.msra.mxu1 %v1687_v18  ;;  %v1642_v18 = vld [vmem:[#allocation5 + $0x160] ss:$8 sps:$4 sm:$0xff]  }
  0x83   :  { %1105 = vmatprep.subr.bf16.mxu1 %v1692_v19  ;;  %v1647_v19 = vld [vmem:[#allocation5 + $0x174] ss:$8 sps:$4 sm:$0xff]  }
  0x85   :  { %812 = vmatpush1.bf16.msra.mxu0 %v1594_v50 }
  0x86   :  { %813 = vmatprep.subr.bf16.mxu0 %v1599_v51  ;;  %1106 = vmatpush1.bf16.msra.mxu1 %v1690_v20  ;;  %v139_v51 = vsub.s32 2, %v130_v32  ;;  %v1645_v20 = vld [vmem:[#allocation5 + $0x170] ss:$8 sps:$4 sm:$0xff]  }
  0x87   :  { %1107 = vmatprep.subr.bf16.mxu1 %v1695_v21  ;;  %v1650_v21 = vld [vmem:[#allocation5 + $0x184] ss:$8 sps:$4 sm:$0xff]  }
  0x89   :  { %814 = vmatpush1.bf16.msra.mxu0 %v1597_v52 }
  0x8a   :  { %815 = vmatprep.subr.bf16.mxu0 %v1602_v53  ;;  %1108 = vmatpush1.bf16.msra.mxu1 %v1693_v22  ;;  %v143_v53 = vsub.s32 3, %v130_v32  ;;  %v1648_v22 = vld [vmem:[#allocation5 + $0x180] ss:$8 sps:$4 sm:$0xff]   ;;  %v1663_v32 = vld [vmem:[#allocation5 + $0x1d0] ss:$8 sps:$4 sm:$0xff]  }
  0x8b   :  { %1109 = vmatprep.subr.bf16.mxu1 %v1698_v23  ;;  %v1653_v23 = vld [vmem:[#allocation5 + $0x194] ss:$8 sps:$4 sm:$0xff]  }
  0x8d   :  { %816 = vmatpush1.bf16.msra.mxu0 %v1600_v54 }
  0x8e   :  { %817 = vmatprep.subr.bf16.mxu0 %v1605_v55  ;;  %1110 = vmatpush1.bf16.msra.mxu1 %v1696_v24  ;;  %v1624_v55 = vld [vmem:[#allocation5 + $0x100] ss:$8 sps:$4 sm:$0xff]   ;;  %v1651_v24 = vld [vmem:[#allocation5 + $0x190] ss:$8 sps:$4 sm:$0xff]  }
  0x8f   :  { %1111 = vmatprep.subr.bf16.mxu1 %v1701_v25  ;;  %v1656_v25 = vld [vmem:[#allocation5 + $0x1a4] ss:$8 sps:$4 sm:$0xff]  }
  0x91   :  { %818 = vmatpush1.bf16.msra.mxu0 %v1603_v56 }
  0x92   :  { %819 = vmatprep.subr.bf16.mxu0 %v1608_v57  ;;  %1112 = vmatpush1.bf16.msra.mxu1 %v1699_v26  ;;  %v1629_v57 = vld [vmem:[#allocation5 + $0x114] ss:$8 sps:$4 sm:$0xff]   ;;  %v1654_v26 = vld [vmem:[#allocation5 + $0x1a0] ss:$8 sps:$4 sm:$0xff]  }
  0x93   :  { %1113 = vmatprep.subr.bf16.mxu1 %v1704_v27  ;;  %v1659_v27 = vld [vmem:[#allocation5 + $0x1b4] ss:$8 sps:$4 sm:$0xff]  }
  0x95   :  { %820 = vmatpush1.bf16.msra.mxu0 %v1606_v58  ;;  %v140_v58 = vrot.slane %v127_v37, %v139_v51 }
  0x96   :  { %821 = vmatprep.subr.bf16.mxu0 %v1611_v59  ;;  %1114 = vmatpush1.bf16.msra.mxu1 %v1702_v28  ;;  %v144_v59 = vrot.slane %v127_v37, %v143_v53  ;;  %v1657_v28 = vld [vmem:[#allocation5 + $0x1b0] ss:$8 sps:$4 sm:$0xff]  }
  0x97   :  { %1115 = vmatprep.subr.bf16.mxu1 %v1707_v30  ;;  %v1660_v30 = vld [vmem:[#allocation5 + $0x1c0] ss:$8 sps:$4 sm:$0xff]   ;;  %v1669_v37 = vld [vmem:[#allocation5 + $0x1f0] ss:$8 sps:$4 sm:$0xff]  }
  0x99   :  { %822 = vmatpush1.bf16.msra.mxu0 %v1609_v60  ;;  %v1627_v60 = vld [vmem:[#allocation5 + $0x110] ss:$8 sps:$4 sm:$0xff]  }
  0x9a   :  { %823 = vmatprep.subr.bf16.mxu0 %v1614_v61  ;;  %1116 = vmatpush1.bf16.msra.mxu1 %v1705_v31  ;;  %v1665_v31 = vld [vmem:[#allocation5 + $0x1d4] ss:$8 sps:$4 sm:$0xff]  }
  0x9b   :  { %1117 = vmatprep.subr.bf16.mxu1 %v1710_v33  ;;  %v1668_v33 = vld [vmem:[#allocation5 + $0x1e4] ss:$8 sps:$4 sm:$0xff]  }
  0x9d   :  { %824 = vmatpush1.bf16.msra.mxu0 %v1612_v62  ;;  %v1632_v62 = vld [vmem:[#allocation5 + $0x124] ss:$8 sps:$4 sm:$0xff]  }
  0x9e   :  { %825 = vmatprep.subr.bf16.mxu0 %v1617_v63  ;;  %1118 = vmatpush1.bf16.msra.mxu1 %v1708_v34  ;;  %v1666_v34 = vld [vmem:[#allocation5 + $0x1e0] ss:$8 sps:$4 sm:$0xff]  }
  0x9f   :  { %1119 = vmatprep.subr.bf16.mxu1 %v1713_v36  ;;  %v1671_v36 = vld [vmem:[#allocation5 + $0x1f4] ss:$8 sps:$4 sm:$0xff]  }
  0xa1   :  { %826 = vmatpush1.bf16.msra.mxu0 %v1615_v1 }
  0xa2   :  { %827 = vmatprep.subr.bf16.mxu0 %v1620_v2  ;;  %1120 = vmatpush1.bf16.msra.mxu1 %v1711_v39 }
  0xa5   :  { %828 = vmatpush1.bf16.msra.mxu0 %v1618_v3 }
  0xa6   :  { %829 = vmatprep.subr.bf16.mxu0 %v1623_v4 }
  0xa9   :  { %830 = vmatpush1.bf16.msra.mxu0 %v1621_v5 }
  0xaa   :  { %842 = vmatprep.subr.bf16.mxu0 %v1626_v6  ;;  %v1630_v6 = vld [vmem:[#allocation5 + $0x120] ss:$8 sps:$4 sm:$0xff]  }
 0x13f   :  { %v343_v41 = vpop.f32.mrb[0].mxu0 }
 0x140   :  { %v345_v43 = vpop.f32.mrb[1].mxu0  ;;  %v344_v45 = vadd.f32 %v343_v41, %v132_v40  ;;  %v386_v61 = vpop.f32.mrb[0].mxu1  ;;  %v1714_v41 = vld [vmem:[#allocation7 + $0xe0] ss:$8 sps:$4 sm:$0xff]  }
 0x141   :  { %v347_v44 = vpop.f32.mrb[2].mxu0  ;;  %v346_v48 = vadd.f32 %v345_v43, %v136_v42  ;;  %v1972_v63 = vadd.f32 %v386_v61, %v140_v58  ;;  %v388_v1 = vpop.f32.mrb[1].mxu1  ;;  %v1717_v43 = vld [vmem:[#allocation7 + $0xf0] ss:$8 sps:$4 sm:$0xff]   ;;  %v1722_v61 = vld [vmem:[#allocation8 + $0x48] sm:$0xff]  }
 0x142   :  { %v348_v46 = vadd.f32 %v347_v44, %v132_v40  ;;  %v349_v47 = vpop.f32.mrb[3].mxu0  ;;  %v389_v2 = vadd.f32 %v388_v1, %v144_v59  ;;  %v390_v3 = vpop.f32.mrb[2].mxu1  ;;  %v1716_v40 = vld [vmem:[#allocation7 + $0xe4] ss:$8 sps:$4 sm:$0xff]   ;;  %v1725_v1 = vld [vmem:[#allocation8 + $0x10] sm:$0xff]  }
 0x143   :  { %v350_v49 = vadd.f32 %v349_v47, %v136_v42  ;;  %v1974_v4 = vadd.f32 %v390_v3, %v140_v58  ;;  %v392_v5 = vpop.f32.mrb[3].mxu1  ;;  %1121 = vmatprep.subr.bf16.mxu1 %v1716_v40  ;;  %v1719_v42 = vld [vmem:[#allocation7 + $0xf4] ss:$8 sps:$4 sm:$0xff]   ;;  %v1720_v44 = vld [vmem:[#allocation8 + $0x40] sm:$0xff]  }
 0x144   :  { %v395_v50 = vpack.c.bf16 %v348_v46, %v344_v45  ;;  %v393_v7 = vadd.f32 %v392_v5, %v144_v59  ;;  %1122 = vmatpush1.bf16.msra.mxu1 %v1714_v41  ;;  %v467_v45 = vld [vmem:[%s2004_s4] sm:$0x3]  ;;  %v1721_v59 = vld [vmem:[#allocation8] sm:$0xff]  }
 0x145   :  { %v396_v52 = vpack.c.bf16 %v350_v49, %v346_v48  ;;  %v397_v9 = vpack.c.bf16 %v1974_v4, %v1972_v63  ;;  %1123 = vmatprep.subr.bf16.mxu1 %v1719_v42  ;;  %v472_v46 = vrot.slane %v467_v45, %v1961_v35  ;;  %v476_v48 = vrot.slane %v467_v45, %v1966_v38  ;;  %v1724_v63 = vld [vmem:[#allocation8 + $0x50] sm:$0xff]   ;;  %v1727_v3 = vld [vmem:[#allocation8 + $0x18] sm:$0xff]   ;;  %v1728_v4 = vld [vmem:[#allocation8 + $0x60] sm:$0xff]  }
 0x146   :  { %v399_v56 = vmax.bf16 %v1840_v0, %v395_v50  ;;  %v398_v10 = vpack.c.bf16 %v393_v7, %v389_v2  ;;  %v1726_v2 = vld [vmem:[#allocation8 + $0x58] sm:$0xff]   ;;  %v1729_v5 = vld [vmem:[#allocation8 + $0x20] sm:$0xff]   ;;  %v1731_v7 = vld [vmem:[#allocation8 + $0x28] sm:$0xff]  }
 0x147   :  { %v400_v54 = vmax.bf16 %v1840_v0, %v396_v52  ;;  %v401_v39 = vmax.bf16 %v1840_v0, %v397_v9  ;;  %v1733_v9 = vld [vmem:[#allocation8 + $0x30] sm:$0xff]  }
 0x148   :  { %v402_v12 = vmax.bf16 %v1840_v0, %v398_v10  ;;  %1124 = vmatpush1.bf16.msra.mxu1 %v1717_v43  ;;  %v1734_v10 = vld [vmem:[#allocation8 + $0x78] sm:$0xff]  }
 0x149   :  { %831 = vmatprep.mubr.bf16.mxu0 %v400_v54  ;;  %1487 = vmatprep.subr.bf16.mxu1 %v1720_v44 }
 0x14a   :  { %832 = vmatmul.mubr.bf16.vlgmr.msra.gmra.mrb[4].mxu0 %v399_v56 }
 0x14b   :  { %843 = vmatpush1.bf16.msra.mxu0 %v1624_v55  ;;  %874 = vmatprep.mubr.bf16.mxu0 %v402_v12  ;;  %v921_v12 = vld [vmem:[%s2006_s6] sm:$0x3] }
 0x14c   :  { %844 = vmatprep.subr.bf16.mxu0 %v1629_v57 }
 0x14f   :  { %845 = vmatpush1.bf16.msra.mxu0 %v1627_v60 }
 0x150   :  { %846 = vmatprep.subr.bf16.mxu0 %v1632_v62  ;;  %v1723_v62 = vld [vmem:[#allocation8 + $0x8] sm:$0xff]  }
 0x153   :  { %847 = vmatpush1.bf16.msra.mxu0 %v1630_v6  ;;  %v1730_v6 = vld [vmem:[#allocation8 + $0x68] sm:$0xff]  }
 0x154   :  { %848 = vmatprep.subr.bf16.mxu0 %v1635_v8  ;;  %v1732_v8 = vld [vmem:[#allocation8 + $0x70] sm:$0xff]  }
 0x157   :  { %849 = vmatpush1.bf16.msra.mxu0 %v1633_v11  ;;  %v1735_v11 = vld [vmem:[#allocation8 + $0x38] sm:$0xff]  }
 0x158   :  { %850 = vmatprep.subr.bf16.mxu0 %v1638_v13  ;;  %v926_v13 = vrot.slane %v921_v12, %v1961_v35 }
 0x15b   :  { %851 = vmatpush1.bf16.msra.mxu0 %v1636_v14 }
 0x15c   :  { %852 = vmatprep.subr.bf16.mxu0 %v1641_v15  ;;  %v930_v15 = vrot.slane %v921_v12, %v1966_v38  ;;  %v1461_v38 = vld [vmem:[%s2008_s8] ss:$0 sm:$0xff] }
 0x15f   :  { %853 = vmatpush1.bf16.msra.mxu0 %v1639_v16 }
 0x160   :  { %854 = vmatprep.subr.bf16.mxu0 %v1644_v17 }
 0x163   :  { %855 = vmatpush1.bf16.msra.mxu0 %v1642_v18 }
 0x164   :  { %856 = vmatprep.subr.bf16.mxu0 %v1647_v19 }
 0x167   :  { %857 = vmatpush1.bf16.msra.mxu0 %v1645_v20 }
 0x168   :  { %858 = vmatprep.subr.bf16.mxu0 %v1650_v21 }
 0x16b   :  { %859 = vmatpush1.bf16.msra.mxu0 %v1648_v22 }
 0x16c   :  { %860 = vmatprep.subr.bf16.mxu0 %v1653_v23 }
 0x16f   :  { %861 = vmatpush1.bf16.msra.mxu0 %v1651_v24 }
 0x170   :  { %862 = vmatprep.subr.bf16.mxu0 %v1656_v25 }
 0x173   :  { %863 = vmatpush1.bf16.msra.mxu0 %v1654_v26 }
 0x174   :  { %864 = vmatprep.subr.bf16.mxu0 %v1659_v27 }
 0x177   :  { %865 = vmatpush1.bf16.msra.mxu0 %v1657_v28 }
 0x178   :  { %866 = vmatprep.subr.bf16.mxu0 %v1662_v29 }
 0x17b   :  { %867 = vmatpush1.bf16.msra.mxu0 %v1660_v30 }
 0x17c   :  { %868 = vmatprep.subr.bf16.mxu0 %v1665_v31 }
 0x17f   :  { %869 = vmatpush1.bf16.msra.mxu0 %v1663_v32 }
 0x180   :  { %870 = vmatprep.subr.bf16.mxu0 %v1668_v33 }
 0x183   :  { %871 = vmatpush1.bf16.msra.mxu0 %v1666_v34 }
 0x184   :  { %872 = vmatprep.subr.bf16.mxu0 %v1671_v36 }
 0x187   :  { %873 = vmatpush1.bf16.msra.mxu0 %v1669_v37 }
 0x18a   :  { %875 = vmatmul.mubr.bf16.vlgmr.msra.gmra.mrb[4].mxu0 %v401_v39 }
 0x25d   :  { %v876_v47 = vpop.f32.mrb[4].mxu0 }
 0x25e   :  { %v878_v49 = vpop.f32.mrb[5].mxu0  ;;  %v1509_v51 = vadd.f32 %v876_v47, %v472_v46 }
 0x25f   :  { %v880_v50 = vpop.f32.mrb[6].mxu0  ;;  %v1510_v54 = vadd.f32 %v878_v49, %v476_v48 }
 0x260   :  { %v1511_v52 = vadd.f32 %v880_v50, %v472_v46  ;;  %v882_v53 = vpop.f32.mrb[7].mxu0 }
 0x261   :  { %v1512_v55 = vadd.f32 %v882_v53, %v476_v48 }
 0x262   :  { %v885_v56 = vpack.c.bf16 %v1511_v52, %v1509_v51 }
 0x263   :  { %v886_v57 = vpack.c.bf16 %v1512_v55, %v1510_v54 }
 0x264   :  { %v887_v60 = vmax.bf16 %v1840_v0, %v885_v56 }
 0x265   :  { %v888_v58 = vmax.bf16 %v1840_v0, %v886_v57 }
 0x267   :  { %1125 = vmatprep.mubr.bf16.mxu1 %v888_v58 }
 0x268   :  { %1126 = vmatmul.mubr.bf16.vlgmr.msra.gmra.mrb[4].mxu1 %v887_v60 }
 0x269   :  { %1488 = vmatpush3.bf16.msra.mxu1 %v1721_v59 }
 0x26a   :  { %1489 = vmatprep.subr.bf16.mxu1 %v1722_v61 }
 0x26d   :  { %1490 = vmatpush3.bf16.msra.mxu1 %v1723_v62 }
 0x26e   :  { %1491 = vmatprep.subr.bf16.mxu1 %v1724_v63 }
 0x271   :  { %1492 = vmatpush3.bf16.msra.mxu1 %v1725_v1 }
 0x272   :  { %1493 = vmatprep.subr.bf16.mxu1 %v1726_v2 }
 0x275   :  { %1494 = vmatpush3.bf16.msra.mxu1 %v1727_v3 }
 0x276   :  { %1495 = vmatprep.subr.bf16.mxu1 %v1728_v4 }
 0x279   :  { %1496 = vmatpush3.bf16.msra.mxu1 %v1729_v5 }
 0x27a   :  { %1497 = vmatprep.subr.bf16.mxu1 %v1730_v6 }
 0x27d   :  { %1498 = vmatpush3.bf16.msra.mxu1 %v1731_v7 }
 0x27e   :  { %1499 = vmatprep.subr.bf16.mxu1 %v1732_v8 }
 0x281   :  { %1500 = vmatpush3.bf16.msra.mxu1 %v1733_v9 }
 0x282   :  { %1501 = vmatprep.subr.bf16.mxu1 %v1734_v10 }
 0x285   :  { %1502 = vmatpush3.bf16.msra.mxu1 %v1735_v11 }
 0x33b   :  { %v1127_v14 = vpop.f32.mrb[4].mxu1 }
 0x33c   :  { %v1129_v16 = vpop.f32.mrb[5].mxu1  ;;  %v1128_v18 = vadd.f32 %v1127_v14, %v926_v13 }
 0x33d   :  { %v1131_v17 = vpop.f32.mrb[6].mxu1  ;;  %v1130_v21 = vadd.f32 %v1129_v16, %v930_v15 }
 0x33e   :  { %v1132_v19 = vadd.f32 %v1131_v17, %v926_v13  ;;  %v1133_v20 = vpop.f32.mrb[7].mxu1 }
 0x33f   :  { %v1134_v22 = vadd.f32 %v1133_v20, %v930_v15 }
 0x340   :  { %v1136_v23 = vpack.c.bf16 %v1132_v19, %v1128_v18 }
 0x341   :  { %v1137_v24 = vpack.c.bf16 %v1134_v22, %v1130_v21 }
 0x342   :  { %v1138_v26 = vmax.bf16 %v1840_v0, %v1136_v23 }
 0x343   :  { %v1139_v25 = vmax.bf16 %v1840_v0, %v1137_v24 }
 0x345   :  { %1307 = vmatprep.mubr.bf16.mxu1 %v1139_v25 }
 0x346   :  { %1308 = vmatmul.mubr.bf16.vlgmr.msra.gmra.mrb[8].mxu1 %v1138_v26 }
 0x419   :  { %v1503_v27 = vpop.f32.mrb[8].mxu1 }
 0x41a   :  { %v1504_v35 = vpop.f32.mrb[9].mxu1 }
 0x41b   :  { %v1505_v28 = vadd.f32 %v1504_v35, %v1503_v27  ;;  %v1506_v29 = vpop.f32.mrb[10].mxu1 }
 0x41c   :  { %v1507_v30 = vpop.f32.mrb[11].mxu1 }
 0x41d   :  { %v1508_v31 = vadd.f32 %v1507_v30, %v1506_v29  ;;  %v1310_v32 = vadd.f32 %v1505_v28, %v1461_v38 }
 0x41f   :  { %v1313_v33 = vadd.f32 %v1508_v31, %v1461_v38 }
 0x421   :  { %v1485_v34 = vpack.c.bf16 %v1313_v33, %v1310_v32 }
 0x423   :  { %1486 = vst [vmem:[%s2009_s9] sm:$0xff] %v1485_v34  }
 0x424   :  { %1330 = vsyncpa [#allocation4], 1 }
 0x425   :  { %1331 = vsyncpa [#allocation6], 1 }
 0x426   :  { %1332 = vsyncpa [#allocation9], 1 }

</bundles_post_ra>
